<compile_context>
chip_gen: v5e
topology: v5e:2x2
jax: 0.10.0
libtpu: 0.0.40
codegen_flags: <defaults>
</compile_context>

<pallas_src>
import functools

import jax
import jax.numpy as jnp
from jax.experimental import pallas as pl
from jax.experimental.pallas import tpu as pltpu

EPS = 1e-5


def _unet_conv_kernel(x_ref, wb1_ref, b1_ref, g1_ref, be1_ref,
                      wb2_ref, b2_ref, g2_ref, be2_ref,
                      o_ref, hpad_ref, *, cout):
    """Whole-module forward in one invocation; everything lane-dense."""
    n, hp2, _ = x_ref.shape            # x: (N, H+2, W*Cin), already H-padded
    h = hp2 - 2
    rows, wcout = o_ref.shape          # (N*H, W*Cout)
    width = wcout // cout
    inv_m = 1.0 / (rows * width)       # 1 / (N*H*W), batch-stat normalizer

    # One-hot lane<->channel maps (lane j holds channel j % Cout), built once
    # from iota. Per-channel reductions / broadcasts then ride the MXU.
    lane = jax.lax.broadcasted_iota(jnp.int32, (wcout, cout), 0)
    chan = jax.lax.broadcasted_iota(jnp.int32, (wcout, cout), 1)
    g_mat = jnp.where(lane % cout == chan, 1.0, 0.0).astype(jnp.float32)
    lane_t = jax.lax.broadcasted_iota(jnp.int32, (cout, wcout), 1)
    chan_t = jax.lax.broadcasted_iota(jnp.int32, (cout, wcout), 0)
    gt_mat = jnp.where(lane_t % cout == chan_t, 1.0, 0.0).astype(jnp.float32)

    def conv_relu(src_ref, wb_ref, bias_row):
        # 3 vertical taps; horizontal taps + padding live inside the banded
        # weight, so each dot has K = src lane width, Nout = W*Cout (=128).
        k = src_ref.shape[-1]
        acc = jnp.zeros((rows, wcout), jnp.float32)
        for dy in range(3):                                  # static, unrolled
            lhs = src_ref[:, dy:dy + h, :].reshape(rows, k)
            acc = acc + jnp.dot(lhs, wb_ref[dy],
                                preferred_element_type=jnp.float32)
        return jnp.maximum(acc + bias_row, 0.0)              # bias + ReLU

    def batchnorm(hd, gamma_row, beta_row):
        # Single-pass batch stats: var = E[x^2] - mean^2 (f32 throughout).
        colsum = jnp.sum(hd, axis=0, keepdims=True)          # (1, W*Cout)
        colsq = jnp.sum(hd * hd, axis=0, keepdims=True)
        mean = jnp.dot(colsum, g_mat,
                       preferred_element_type=jnp.float32) * inv_m   # (1, C)
        ex2 = jnp.dot(colsq, g_mat,
                      preferred_element_type=jnp.float32) * inv_m
        rstd = jax.lax.rsqrt(ex2 - mean * mean + EPS)
        mean_d = jnp.dot(mean, gt_mat, preferred_element_type=jnp.float32)
        rstd_d = jnp.dot(rstd, gt_mat, preferred_element_type=jnp.float32)
        return (hd - mean_d) * (rstd_d * gamma_row) + beta_row

    # ---- conv1 + ReLU + bn1 (taps read directly from the padded input)
    hid = batchnorm(conv_relu(x_ref, wb1_ref, b1_ref[...]),
                    g1_ref[...], be1_ref[...])

    # ---- stage hidden for conv2: zero ONLY the two halo rows, then interior
    zrow = jnp.zeros((n, 1, wcout), jnp.float32)
    hpad_ref[:, 0:1, :] = zrow
    hpad_ref[:, h + 1:h + 2, :] = zrow
    hpad_ref[:, 1:h + 1, :] = hid.reshape(n, h, wcout)

    # ---- conv2 + ReLU + bn2, lane-dense (unmasked) output store
    o_ref[...] = batchnorm(conv_relu(hpad_ref, wb2_ref, b2_ref[...]),
                           g2_ref[...], be2_ref[...])


def _banded_weight(w_hwio, width):
    """(3,3,Cin,Cout) HWIO -> (3, width*Cin, width*Cout) block-banded.

    wb[dy, wi*Cin+ci, wo*Cout+co] = w[dy, wi-wo+1, ci, co] when |wi-wo| <= 1,
    else 0: the horizontal taps and the padding=1 edge clipping are folded
    into one banded matrix per vertical tap.
    """
    kh, kw, cin, cout = w_hwio.shape
    band = jnp.stack([jnp.eye(width, width, k=1 - dx, dtype=w_hwio.dtype)
                      for dx in range(kw)])                   # (kw, wi, wo)
    wb = jnp.einsum("yxio,xpw->ypiwo", w_hwio, band)
    return wb.reshape(kh, width * cin, width * cout)


@jax.jit
def unet_conv_module(x_nchw, params):
    """PyTorch-facing wrapper: NCHW in, NCHW out."""
    w1, b1, g1, be1, w2, b2, g2, be2 = params
    n, cin, h, w = x_nchw.shape
    cout = w1.shape[-1]
    wcin, wcout = w * cin, w * cout

    # NCHW -> NHWC, H-pad by 1, fold (W, C) into the lane axis. These layout
    # ops exist only to match the PyTorch NCHW interface; in an NHWC pipeline
    # they disappear.
    x = jnp.transpose(x_nchw, (0, 2, 3, 1)).astype(jnp.float32)
    x = jnp.pad(x, ((0, 0), (1, 1), (0, 0), (0, 0))).reshape(n, h + 2, wcin)

    # NOTE: on v6e/v7x at real channel counts, cast wb*/x to bf16 here (f32
    # accumulation stays inside the kernel); kept f32 to match PyTorch f32.
    wb1 = _banded_weight(w1.astype(jnp.float32), w)     # (3, W*Cin,  W*Cout)
    wb2 = _banded_weight(w2.astype(jnp.float32), w)     # (3, W*Cout, W*Cout)

    def lane_tile(p):   # (Cout,) -> (1, W*Cout), lane j holds p[j % Cout]
        return jnp.tile(p.reshape(1, cout).astype(jnp.float32), (1, w))

    b1d, g1d, be1d = lane_tile(b1), lane_tile(g1), lane_tile(be1)
    b2d, g2d, be2d = lane_tile(b2), lane_tile(g2), lane_tile(be2)

    # Scoped-VMEM limit sized to the actual resident buffers (+ headroom).
    resident_bytes = 4 * (x.size + wb1.size + wb2.size + 6 * wcout
                          + n * h * wcout            # output
                          + n * (h + 2) * wcout)     # shared padded scratch
    vmem_limit = int(min(4 * resident_bytes + (8 << 20), 48 << 20))

    vmem = pl.BlockSpec(memory_space=pltpu.MemorySpace.VMEM)
    out2d = pl.pallas_call(
        functools.partial(_unet_conv_kernel, cout=cout),
        out_shape=jax.ShapeDtypeStruct((n * h, wcout), jnp.float32),
        in_specs=[vmem] * 9,
        out_specs=vmem,
        scratch_shapes=[pltpu.VMEM((n, h + 2, wcout), jnp.float32)],
        compiler_params=pltpu.CompilerParams(vmem_limit_bytes=vmem_limit),
    )(x, wb1, b1d, g1d, be1d, wb2, b2d, g2d, be2d)

    out = out2d.reshape(n, h, w, cout)                  # lane-dense -> NHWC
    return jnp.transpose(out, (0, 3, 1, 2))             # NHWC -> NCHW


def ref_forward(x_nchw, params):
    """Pure-JAX reference (same semantics, no Pallas) for correctness check."""
    w1, b1, g1, be1, w2, b2, g2, be2 = params
    x = jnp.transpose(x_nchw, (0, 2, 3, 1)).astype(jnp.float32)

    def conv(x, w, b):
        y = jax.lax.conv_general_dilated(
            x, w, window_strides=(1, 1), padding="SAME",
            dimension_numbers=("NHWC", "HWIO", "NHWC"))
        return y + b

    def bn(x, g, be):
        m = jnp.mean(x, axis=(0, 1, 2), keepdims=True)
        v = jnp.mean((x - m) ** 2, axis=(0, 1, 2), keepdims=True)
        return (x - m) * jax.lax.rsqrt(v + EPS) * g + be

    x = bn(jnp.maximum(conv(x, w1, b1), 0.0), g1, be1)
    x = bn(jnp.maximum(conv(x, w2, b2), 0.0), g2, be2)
    return jnp.transpose(x, (0, 3, 1, 2))


def init_params(key, cin, cout):
    """Deterministic synthetic parameters (shapes match nn.Conv2d / BatchNorm2d)."""
    ks = jax.random.split(key, 8)
    bound1 = 1.0 / jnp.sqrt(cin * 9.0)
    bound2 = 1.0 / jnp.sqrt(cout * 9.0)
    w1 = jax.random.uniform(ks[0], (3, 3, cin, cout), jnp.float32, -bound1, bound1)
    b1 = jax.random.uniform(ks[1], (cout,), jnp.float32, -bound1, bound1)
    w2 = jax.random.uniform(ks[2], (3, 3, cout, cout), jnp.float32, -bound2, bound2)
    b2 = jax.random.uniform(ks[3], (cout,), jnp.float32, -bound2, bound2)
    g1 = jax.random.uniform(ks[4], (cout,), jnp.float32, 0.5, 1.5)
    be1 = 0.1 * jax.random.normal(ks[5], (cout,), jnp.float32)
    g2 = jax.random.uniform(ks[6], (cout,), jnp.float32, 0.5, 1.5)
    be2 = 0.1 * jax.random.normal(ks[7], (cout,), jnp.float32)
    return (w1, b1, g1, be1, w2, b2, g2, be2)


if __name__ == "__main__":
    key = jax.random.PRNGKey(0)
    kx, kp = jax.random.split(key)

    N, Cin, Cout, H, W = 2, 4, 8, 16, 16
    x = jax.random.normal(kx, (N, Cin, H, W), jnp.float32)   # NCHW like PyTorch
    params = init_params(kp, Cin, Cout)

    out = jax.block_until_ready(unet_conv_module(x, params))

    ref = jax.block_until_ready(ref_forward(x, params))
    assert out.shape == (N, Cout, H, W), out.shape
    assert jnp.allclose(out, ref, rtol=2e-4, atol=2e-4), (
        f"max abs err = {jnp.max(jnp.abs(out - ref))}")

    print("KERNEL_OK")
</pallas_src>

<mosaic_0001>
module attributes {stable_mosaic.version = 11 : i64} {
  func.func @_unet_conv_kernel(%arg0: memref<2x18x64xf32, #tpu.memory_space<vmem>>, %arg1: memref<3x64x128xf32, #tpu.memory_space<vmem>>, %arg2: memref<1x128xf32, #tpu.memory_space<vmem>>, %arg3: memref<1x128xf32, #tpu.memory_space<vmem>>, %arg4: memref<1x128xf32, #tpu.memory_space<vmem>>, %arg5: memref<3x128x128xf32, #tpu.memory_space<vmem>>, %arg6: memref<1x128xf32, #tpu.memory_space<vmem>>, %arg7: memref<1x128xf32, #tpu.memory_space<vmem>>, %arg8: memref<1x128xf32, #tpu.memory_space<vmem>>, %arg9: memref<32x128xf32, #tpu.memory_space<vmem>>, %arg10: memref<2x18x128xf32, #tpu.memory_space<vmem>>) attributes {dimension_semantics = [], scalar_prefetch = 0 : i64, scratch_operands = 1 : i64, tpu.core_type = #tpu.core_type<tc>} {
    %0 = tpu.iota {dimensions = array<i32: 0>} : vector<128x8xi32>
    %1 = tpu.iota {dimensions = array<i32: 1>} : vector<128x8xi32>
    %c8_i32 = arith.constant 8 : i32
    %c0_i32 = arith.constant 0 : i32
    %2 = arith.cmpi eq, %c8_i32, %c0_i32 : i32
    %c1_i32 = arith.constant 1 : i32
    %3 = arith.select %2, %c1_i32, %c8_i32 : i32
    %4 = vector.broadcast %3 : i32 to vector<128x8xi32>
    %5 = arith.remsi %0, %4 : vector<128x8xi32>
    %c0_i32_0 = arith.constant 0 : i32
    %6 = vector.broadcast %c0_i32_0 : i32 to vector<128x8xi32>
    %7 = arith.cmpi ne, %5, %6 : vector<128x8xi32>
    %c0_i32_1 = arith.constant 0 : i32
    %8 = vector.broadcast %c0_i32_1 : i32 to vector<128x8xi32>
    %9 = arith.cmpi slt, %5, %8 : vector<128x8xi32>
    %c0_i32_2 = arith.constant 0 : i32
    %10 = arith.cmpi slt, %3, %c0_i32_2 : i32
    %11 = vector.broadcast %10 : i1 to vector<128x8xi1>
    %12 = vector.broadcast %11 : vector<128x8xi1> to vector<128x8xi1>
    %13 = arith.xori %9, %12 : vector<128x8xi1>
    %14 = arith.andi %13, %7 : vector<128x8xi1>
    %15 = vector.broadcast %3 : i32 to vector<128x8xi32>
    %16 = arith.addi %5, %15 : vector<128x8xi32>
    %17 = arith.select %14, %16, %5 : vector<128x8xi1>, vector<128x8xi32>
    %18 = arith.cmpi eq, %17, %1 : vector<128x8xi32>
    %cst = arith.constant 1.000000e+00 : f32
    %cst_3 = arith.constant 0.000000e+00 : f32
    %19 = vector.broadcast %cst : f32 to vector<128x8xf32>
    %20 = vector.broadcast %cst_3 : f32 to vector<128x8xf32>
    %21 = arith.select %18, %19, %20 : vector<128x8xi1>, vector<128x8xf32>
    %22 = tpu.iota {dimensions = array<i32: 1>} : vector<8x128xi32>
    %23 = tpu.iota {dimensions = array<i32: 0>} : vector<8x128xi32>
    %c8_i32_4 = arith.constant 8 : i32
    %c0_i32_5 = arith.constant 0 : i32
    %24 = arith.cmpi eq, %c8_i32_4, %c0_i32_5 : i32
    %c1_i32_6 = arith.constant 1 : i32
    %25 = arith.select %24, %c1_i32_6, %c8_i32_4 : i32
    %26 = vector.broadcast %25 : i32 to vector<8x128xi32>
    %27 = arith.remsi %22, %26 : vector<8x128xi32>
    %c0_i32_7 = arith.constant 0 : i32
    %28 = vector.broadcast %c0_i32_7 : i32 to vector<8x128xi32>
    %29 = arith.cmpi ne, %27, %28 : vector<8x128xi32>
    %c0_i32_8 = arith.constant 0 : i32
    %30 = vector.broadcast %c0_i32_8 : i32 to vector<8x128xi32>
    %31 = arith.cmpi slt, %27, %30 : vector<8x128xi32>
    %c0_i32_9 = arith.constant 0 : i32
    %32 = arith.cmpi slt, %25, %c0_i32_9 : i32
    %33 = vector.broadcast %32 : i1 to vector<8x128xi1>
    %34 = vector.broadcast %33 : vector<8x128xi1> to vector<8x128xi1>
    %35 = arith.xori %31, %34 : vector<8x128xi1>
    %36 = arith.andi %35, %29 : vector<8x128xi1>
    %37 = vector.broadcast %25 : i32 to vector<8x128xi32>
    %38 = arith.addi %27, %37 : vector<8x128xi32>
    %39 = arith.select %36, %38, %27 : vector<8x128xi1>, vector<8x128xi32>
    %40 = arith.cmpi eq, %39, %23 : vector<8x128xi32>
    %cst_10 = arith.constant 1.000000e+00 : f32
    %cst_11 = arith.constant 0.000000e+00 : f32
    %41 = vector.broadcast %cst_10 : f32 to vector<8x128xf32>
    %42 = vector.broadcast %cst_11 : f32 to vector<8x128xf32>
    %43 = arith.select %40, %41, %42 : vector<8x128xi1>, vector<8x128xf32>
    %c0 = arith.constant 0 : index
    %c0_12 = arith.constant 0 : index
    %44 = vector.load %arg2[%c0, %c0_12] : memref<1x128xf32, #tpu.memory_space<vmem>>, vector<1x128xf32>
    %cst_13 = arith.constant 0.000000e+00 : f32
    %45 = vector.broadcast %cst_13 : f32 to vector<32x128xf32>
    %c0_14 = arith.constant 0 : index
    %c0_15 = arith.constant 0 : index
    %c0_16 = arith.constant 0 : index
    %46 = vector.load %arg0[%c0_14, %c0_15, %c0_16] : memref<2x18x64xf32, #tpu.memory_space<vmem>>, vector<2x16x64xf32>
    %47 = vector.shape_cast %46 : vector<2x16x64xf32> to vector<32x64xf32>
    %c0_17 = arith.constant 0 : index
    %c0_18 = arith.constant 0 : index
    %c0_19 = arith.constant 0 : index
    %48 = vector.load %arg1[%c0_17, %c0_18, %c0_19] : memref<3x64x128xf32, #tpu.memory_space<vmem>>, vector<1x64x128xf32>
    %49 = vector.shape_cast %48 : vector<1x64x128xf32> to vector<64x128xf32>
    %cst_20 = arith.constant dense<0.000000e+00> : vector<32x128xf32>
    %50 = tpu.matmul %47, %49, %cst_20 {dimension_numbers = #tpu.dot_dimension_numbers<[1], [0], [0], [1], [0, 0, 1, 1], [], []>} : vector<32x64xf32>, vector<64x128xf32>, vector<32x128xf32> -> vector<32x128xf32>
    %51 = arith.addf %45, %50 : vector<32x128xf32>
    %c0_21 = arith.constant 0 : index
    %c1 = arith.constant 1 : index
    %c0_22 = arith.constant 0 : index
    %52 = vector.load %arg0[%c0_21, %c1, %c0_22] : memref<2x18x64xf32, #tpu.memory_space<vmem>>, vector<2x16x64xf32>
    %53 = vector.shape_cast %52 : vector<2x16x64xf32> to vector<32x64xf32>
    %c1_23 = arith.constant 1 : index
    %c0_24 = arith.constant 0 : index
    %c0_25 = arith.constant 0 : index
    %54 = vector.load %arg1[%c1_23, %c0_24, %c0_25] : memref<3x64x128xf32, #tpu.memory_space<vmem>>, vector<1x64x128xf32>
    %55 = vector.shape_cast %54 : vector<1x64x128xf32> to vector<64x128xf32>
    %cst_26 = arith.constant dense<0.000000e+00> : vector<32x128xf32>
    %56 = tpu.matmul %53, %55, %cst_26 {dimension_numbers = #tpu.dot_dimension_numbers<[1], [0], [0], [1], [0, 0, 1, 1], [], []>} : vector<32x64xf32>, vector<64x128xf32>, vector<32x128xf32> -> vector<32x128xf32>
    %57 = arith.addf %51, %56 : vector<32x128xf32>
    %c0_27 = arith.constant 0 : index
    %c2 = arith.constant 2 : index
    %c0_28 = arith.constant 0 : index
    %58 = vector.load %arg0[%c0_27, %c2, %c0_28] : memref<2x18x64xf32, #tpu.memory_space<vmem>>, vector<2x16x64xf32>
    %59 = vector.shape_cast %58 : vector<2x16x64xf32> to vector<32x64xf32>
    %c2_29 = arith.constant 2 : index
    %c0_30 = arith.constant 0 : index
    %c0_31 = arith.constant 0 : index
    %60 = vector.load %arg1[%c2_29, %c0_30, %c0_31] : memref<3x64x128xf32, #tpu.memory_space<vmem>>, vector<1x64x128xf32>
    %61 = vector.shape_cast %60 : vector<1x64x128xf32> to vector<64x128xf32>
    %cst_32 = arith.constant dense<0.000000e+00> : vector<32x128xf32>
    %62 = tpu.matmul %59, %61, %cst_32 {dimension_numbers = #tpu.dot_dimension_numbers<[1], [0], [0], [1], [0, 0, 1, 1], [], []>} : vector<32x64xf32>, vector<64x128xf32>, vector<32x128xf32> -> vector<32x128xf32>
    %63 = arith.addf %57, %62 : vector<32x128xf32>
    %64 = vector.broadcast %44 : vector<1x128xf32> to vector<32x128xf32>
    %65 = arith.addf %63, %64 : vector<32x128xf32>
    %cst_33 = arith.constant 0.000000e+00 : f32
    %66 = vector.broadcast %cst_33 : f32 to vector<32x128xf32>
    %67 = arith.maximumf %65, %66 : vector<32x128xf32>
    %c0_34 = arith.constant 0 : index
    %c0_35 = arith.constant 0 : index
    %68 = vector.load %arg3[%c0_34, %c0_35] : memref<1x128xf32, #tpu.memory_space<vmem>>, vector<1x128xf32>
    %c0_36 = arith.constant 0 : index
    %c0_37 = arith.constant 0 : index
    %69 = vector.load %arg4[%c0_36, %c0_37] : memref<1x128xf32, #tpu.memory_space<vmem>>, vector<1x128xf32>
    %cst_38 = arith.constant dense<0.000000e+00> : vector<128xf32>
    %70 = vector.multi_reduction <add>, %67, %cst_38 [0] : vector<32x128xf32> to vector<128xf32>
    %71 = vector.shape_cast %70 : vector<128xf32> to vector<1x128xf32>
    %72 = arith.mulf %67, %67 : vector<32x128xf32>
    %cst_39 = arith.constant dense<0.000000e+00> : vector<128xf32>
    %73 = vector.multi_reduction <add>, %72, %cst_39 [0] : vector<32x128xf32> to vector<128xf32>
    %74 = vector.shape_cast %73 : vector<128xf32> to vector<1x128xf32>
    %cst_40 = arith.constant dense<0.000000e+00> : vector<1x8xf32>
    %75 = tpu.matmul %71, %21, %cst_40 {dimension_numbers = #tpu.dot_dimension_numbers<[1], [0], [0], [1], [0, 0, 1, 1], [], []>} : vector<1x128xf32>, vector<128x8xf32>, vector<1x8xf32> -> vector<1x8xf32>
    %cst_41 = arith.constant 0.001953125 : f32
    %76 = vector.broadcast %cst_41 : f32 to vector<1x8xf32>
    %77 = arith.mulf %75, %76 : vector<1x8xf32>
    %cst_42 = arith.constant dense<0.000000e+00> : vector<1x8xf32>
    %78 = tpu.matmul %74, %21, %cst_42 {dimension_numbers = #tpu.dot_dimension_numbers<[1], [0], [0], [1], [0, 0, 1, 1], [], []>} : vector<1x128xf32>, vector<128x8xf32>, vector<1x8xf32> -> vector<1x8xf32>
    %cst_43 = arith.constant 0.001953125 : f32
    %79 = vector.broadcast %cst_43 : f32 to vector<1x8xf32>
    %80 = arith.mulf %78, %79 : vector<1x8xf32>
    %81 = arith.mulf %77, %77 : vector<1x8xf32>
    %82 = arith.subf %80, %81 : vector<1x8xf32>
    %cst_44 = arith.constant 9.99999974E-6 : f32
    %83 = vector.broadcast %cst_44 : f32 to vector<1x8xf32>
    %84 = arith.addf %82, %83 : vector<1x8xf32>
    %85 = math.rsqrt %84 : vector<1x8xf32>
    %cst_45 = arith.constant dense<0.000000e+00> : vector<1x128xf32>
    %86 = tpu.matmul %77, %43, %cst_45 {dimension_numbers = #tpu.dot_dimension_numbers<[1], [0], [0], [1], [0, 0, 1, 1], [], []>} : vector<1x8xf32>, vector<8x128xf32>, vector<1x128xf32> -> vector<1x128xf32>
    %cst_46 = arith.constant dense<0.000000e+00> : vector<1x128xf32>
    %87 = tpu.matmul %85, %43, %cst_46 {dimension_numbers = #tpu.dot_dimension_numbers<[1], [0], [0], [1], [0, 0, 1, 1], [], []>} : vector<1x8xf32>, vector<8x128xf32>, vector<1x128xf32> -> vector<1x128xf32>
    %88 = vector.broadcast %86 : vector<1x128xf32> to vector<32x128xf32>
    %89 = arith.subf %67, %88 : vector<32x128xf32>
    %90 = arith.mulf %87, %68 : vector<1x128xf32>
    %91 = vector.broadcast %90 : vector<1x128xf32> to vector<32x128xf32>
    %92 = arith.mulf %89, %91 : vector<32x128xf32>
    %93 = vector.broadcast %69 : vector<1x128xf32> to vector<32x128xf32>
    %94 = arith.addf %92, %93 : vector<32x128xf32>
    %cst_47 = arith.constant 0.000000e+00 : f32
    %95 = vector.broadcast %cst_47 : f32 to vector<2x1x128xf32>
    %c0_48 = arith.constant 0 : index
    %c0_49 = arith.constant 0 : index
    %c0_50 = arith.constant 0 : index
    %96 = vector.load %arg10[%c0_48, %c0_49, %c0_50] : memref<2x18x128xf32, #tpu.memory_space<vmem>>, vector<2x1x128xf32>
    tpu.vector_store %arg10[%c0_48, %c0_49, %c0_50], %95 {strides = array<i32>} : memref<2x18x128xf32, #tpu.memory_space<vmem>>, vector<2x1x128xf32>,
    %c0_51 = arith.constant 0 : index
    %c17 = arith.constant 17 : index
    %c0_52 = arith.constant 0 : index
    %97 = vector.load %arg10[%c0_51, %c17, %c0_52] : memref<2x18x128xf32, #tpu.memory_space<vmem>>, vector<2x1x128xf32>
    tpu.vector_store %arg10[%c0_51, %c17, %c0_52], %95 {strides = array<i32>} : memref<2x18x128xf32, #tpu.memory_space<vmem>>, vector<2x1x128xf32>,
    %98 = vector.shape_cast %94 : vector<32x128xf32> to vector<2x16x128xf32>
    %c0_53 = arith.constant 0 : index
    %c1_54 = arith.constant 1 : index
    %c0_55 = arith.constant 0 : index
    %99 = vector.load %arg10[%c0_53, %c1_54, %c0_55] : memref<2x18x128xf32, #tpu.memory_space<vmem>>, vector<2x16x128xf32>
    tpu.vector_store %arg10[%c0_53, %c1_54, %c0_55], %98 {strides = array<i32>} : memref<2x18x128xf32, #tpu.memory_space<vmem>>, vector<2x16x128xf32>,
    %c0_56 = arith.constant 0 : index
    %c0_57 = arith.constant 0 : index
    %100 = vector.load %arg6[%c0_56, %c0_57] : memref<1x128xf32, #tpu.memory_space<vmem>>, vector<1x128xf32>
    %cst_58 = arith.constant 0.000000e+00 : f32
    %101 = vector.broadcast %cst_58 : f32 to vector<32x128xf32>
    %c0_59 = arith.constant 0 : index
    %c0_60 = arith.constant 0 : index
    %c0_61 = arith.constant 0 : index
    %102 = vector.load %arg10[%c0_59, %c0_60, %c0_61] : memref<2x18x128xf32, #tpu.memory_space<vmem>>, vector<2x16x128xf32>
    %103 = vector.shape_cast %102 : vector<2x16x128xf32> to vector<32x128xf32>
    %c0_62 = arith.constant 0 : index
    %c0_63 = arith.constant 0 : index
    %c0_64 = arith.constant 0 : index
    %104 = vector.load %arg5[%c0_62, %c0_63, %c0_64] : memref<3x128x128xf32, #tpu.memory_space<vmem>>, vector<1x128x128xf32>
    %105 = vector.shape_cast %104 : vector<1x128x128xf32> to vector<128x128xf32>
    %cst_65 = arith.constant dense<0.000000e+00> : vector<32x128xf32>
    %106 = tpu.matmul %103, %105, %cst_65 {dimension_numbers = #tpu.dot_dimension_numbers<[1], [0], [0], [1], [0, 0, 1, 1], [], []>} : vector<32x128xf32>, vector<128x128xf32>, vector<32x128xf32> -> vector<32x128xf32>
    %107 = arith.addf %101, %106 : vector<32x128xf32>
    %c0_66 = arith.constant 0 : index
    %c1_67 = arith.constant 1 : index
    %c0_68 = arith.constant 0 : index
    %108 = vector.load %arg10[%c0_66, %c1_67, %c0_68] : memref<2x18x128xf32, #tpu.memory_space<vmem>>, vector<2x16x128xf32>
    %109 = vector.shape_cast %108 : vector<2x16x128xf32> to vector<32x128xf32>
    %c1_69 = arith.constant 1 : index
    %c0_70 = arith.constant 0 : index
    %c0_71 = arith.constant 0 : index
    %110 = vector.load %arg5[%c1_69, %c0_70, %c0_71] : memref<3x128x128xf32, #tpu.memory_space<vmem>>, vector<1x128x128xf32>
    %111 = vector.shape_cast %110 : vector<1x128x128xf32> to vector<128x128xf32>
    %cst_72 = arith.constant dense<0.000000e+00> : vector<32x128xf32>
    %112 = tpu.matmul %109, %111, %cst_72 {dimension_numbers = #tpu.dot_dimension_numbers<[1], [0], [0], [1], [0, 0, 1, 1], [], []>} : vector<32x128xf32>, vector<128x128xf32>, vector<32x128xf32> -> vector<32x128xf32>
    %113 = arith.addf %107, %112 : vector<32x128xf32>
    %c0_73 = arith.constant 0 : index
    %c2_74 = arith.constant 2 : index
    %c0_75 = arith.constant 0 : index
    %114 = vector.load %arg10[%c0_73, %c2_74, %c0_75] : memref<2x18x128xf32, #tpu.memory_space<vmem>>, vector<2x16x128xf32>
    %115 = vector.shape_cast %114 : vector<2x16x128xf32> to vector<32x128xf32>
    %c2_76 = arith.constant 2 : index
    %c0_77 = arith.constant 0 : index
    %c0_78 = arith.constant 0 : index
    %116 = vector.load %arg5[%c2_76, %c0_77, %c0_78] : memref<3x128x128xf32, #tpu.memory_space<vmem>>, vector<1x128x128xf32>
    %117 = vector.shape_cast %116 : vector<1x128x128xf32> to vector<128x128xf32>
    %cst_79 = arith.constant dense<0.000000e+00> : vector<32x128xf32>
    %118 = tpu.matmul %115, %117, %cst_79 {dimension_numbers = #tpu.dot_dimension_numbers<[1], [0], [0], [1], [0, 0, 1, 1], [], []>} : vector<32x128xf32>, vector<128x128xf32>, vector<32x128xf32> -> vector<32x128xf32>
    %119 = arith.addf %113, %118 : vector<32x128xf32>
    %120 = vector.broadcast %100 : vector<1x128xf32> to vector<32x128xf32>
    %121 = arith.addf %119, %120 : vector<32x128xf32>
    %cst_80 = arith.constant 0.000000e+00 : f32
    %122 = vector.broadcast %cst_80 : f32 to vector<32x128xf32>
    %123 = arith.maximumf %121, %122 : vector<32x128xf32>
    %c0_81 = arith.constant 0 : index
    %c0_82 = arith.constant 0 : index
    %124 = vector.load %arg7[%c0_81, %c0_82] : memref<1x128xf32, #tpu.memory_space<vmem>>, vector<1x128xf32>
    %c0_83 = arith.constant 0 : index
    %c0_84 = arith.constant 0 : index
    %125 = vector.load %arg8[%c0_83, %c0_84] : memref<1x128xf32, #tpu.memory_space<vmem>>, vector<1x128xf32>
    %cst_85 = arith.constant dense<0.000000e+00> : vector<128xf32>
    %126 = vector.multi_reduction <add>, %123, %cst_85 [0] : vector<32x128xf32> to vector<128xf32>
    %127 = vector.shape_cast %126 : vector<128xf32> to vector<1x128xf32>
    %128 = arith.mulf %123, %123 : vector<32x128xf32>
    %cst_86 = arith.constant dense<0.000000e+00> : vector<128xf32>
    %129 = vector.multi_reduction <add>, %128, %cst_86 [0] : vector<32x128xf32> to vector<128xf32>
    %130 = vector.shape_cast %129 : vector<128xf32> to vector<1x128xf32>
    %cst_87 = arith.constant dense<0.000000e+00> : vector<1x8xf32>
    %131 = tpu.matmul %127, %21, %cst_87 {dimension_numbers = #tpu.dot_dimension_numbers<[1], [0], [0], [1], [0, 0, 1, 1], [], []>} : vector<1x128xf32>, vector<128x8xf32>, vector<1x8xf32> -> vector<1x8xf32>
    %cst_88 = arith.constant 0.001953125 : f32
    %132 = vector.broadcast %cst_88 : f32 to vector<1x8xf32>
    %133 = arith.mulf %131, %132 : vector<1x8xf32>
    %cst_89 = arith.constant dense<0.000000e+00> : vector<1x8xf32>
    %134 = tpu.matmul %130, %21, %cst_89 {dimension_numbers = #tpu.dot_dimension_numbers<[1], [0], [0], [1], [0, 0, 1, 1], [], []>} : vector<1x128xf32>, vector<128x8xf32>, vector<1x8xf32> -> vector<1x8xf32>
    %cst_90 = arith.constant 0.001953125 : f32
    %135 = vector.broadcast %cst_90 : f32 to vector<1x8xf32>
    %136 = arith.mulf %134, %135 : vector<1x8xf32>
    %137 = arith.mulf %133, %133 : vector<1x8xf32>
    %138 = arith.subf %136, %137 : vector<1x8xf32>
    %cst_91 = arith.constant 9.99999974E-6 : f32
    %139 = vector.broadcast %cst_91 : f32 to vector<1x8xf32>
    %140 = arith.addf %138, %139 : vector<1x8xf32>
    %141 = math.rsqrt %140 : vector<1x8xf32>
    %cst_92 = arith.constant dense<0.000000e+00> : vector<1x128xf32>
    %142 = tpu.matmul %133, %43, %cst_92 {dimension_numbers = #tpu.dot_dimension_numbers<[1], [0], [0], [1], [0, 0, 1, 1], [], []>} : vector<1x8xf32>, vector<8x128xf32>, vector<1x128xf32> -> vector<1x128xf32>
    %cst_93 = arith.constant dense<0.000000e+00> : vector<1x128xf32>
    %143 = tpu.matmul %141, %43, %cst_93 {dimension_numbers = #tpu.dot_dimension_numbers<[1], [0], [0], [1], [0, 0, 1, 1], [], []>} : vector<1x8xf32>, vector<8x128xf32>, vector<1x128xf32> -> vector<1x128xf32>
    %144 = vector.broadcast %142 : vector<1x128xf32> to vector<32x128xf32>
    %145 = arith.subf %123, %144 : vector<32x128xf32>
    %146 = arith.mulf %143, %124 : vector<1x128xf32>
    %147 = vector.broadcast %146 : vector<1x128xf32> to vector<32x128xf32>
    %148 = arith.mulf %145, %147 : vector<32x128xf32>
    %149 = vector.broadcast %125 : vector<1x128xf32> to vector<32x128xf32>
    %150 = arith.addf %148, %149 : vector<32x128xf32>
    %c0_94 = arith.constant 0 : index
    %c0_95 = arith.constant 0 : index
    %151 = vector.load %arg9[%c0_94, %c0_95] : memref<32x128xf32, #tpu.memory_space<vmem>>, vector<32x128xf32>
    tpu.vector_store %arg9[%c0_94, %c0_95], %150 {strides = array<i32>} : memref<32x128xf32, #tpu.memory_space<vmem>>, vector<32x128xf32>,
    return
  }
}

</mosaic_0001>

<bundles_post_ra>
// kernel: unet_conv_module.1
= control target key start
LH: loop header
LB: loop body
LE: loop exit
PB: predicated region body
PF: predicated region fallthrough
CT: control target
= control target key end

     0   :  { %vm315_vm0 = vcmask 523264   ;;  %v32_v36 = vlaneseq  ;;  %v1077_v45 = vmov 1.0   ;;  %s1779_s1 = inlined_call_operand.vmem [shape: f32[3,64,128], index: 1, kind: input, shape index: {}]   ;;  %s1780_s0 = inlined_call_operand.vmem [shape: f32[2,18,64], index: 0, kind: input, shape index: {}]   ;;  %s1781_s2 = inlined_call_operand.vmem [shape: f32[1,128], index: 2, kind: input, shape index: {}]   ;;  %s1782_s4 = inlined_call_operand.vmem [shape: f32[1,128], index: 4, kind: input, shape index: {}]   ;;  %s1783_s5 = inlined_call_operand.vmem [shape: f32[3,128,128], index: 5, kind: input, shape index: {}]   ;;  %s1784_s3 = inlined_call_operand.vmem [shape: f32[1,128], index: 3, kind: input, shape index: {}]   ;;  %s1785_s6 = inlined_call_operand.vmem [shape: f32[1,128], index: 6, kind: input, shape index: {}]   ;;  %s1786_s8 = inlined_call_operand.vmem [shape: f32[1,128], index: 8, kind: input, shape index: {}]   ;;  %s1787_s7 = inlined_call_operand.vmem [shape: f32[1,128], index: 7, kind: input, shape index: {}]   ;;  %s1788_s9 = inlined_call_operand.vmem [shape: f32[32,128], index: 9, kind: output, shape index: {}]  }
   0x1   :  { %v958_v0 = vld [vmem:[%s1779_s1 + $0xb8] sm:$0xff]  ;;  %v957_v1 = vld [vmem:[%s1779_s1 + $0xb0] sm:$0xff]  ;;  %v956_v5 = vld [vmem:[%s1779_s1 + $0xa8] sm:$0xff] }
   0x2   :  { %v942_v2 = vld [vmem:[%s1779_s1 + $0x78] sm:$0xff]  ;;  %431 = vmatpush.msra.mxu2 %v958_v0  ;;  %v941_v4 = vld [vmem:[%s1779_s1 + $0x70] sm:$0xff]  ;;  %v940_v7 = vld [vmem:[%s1779_s1 + $0x68] sm:$0xff]  ;;  %v1249_v37 = vshrl.u32 %v32_v36, 7  ;;  %v1252_v39 = vand.u32 127, %v32_v36 }
   0x3   :  { %336 = vmatpush.msra.mxu0 %v942_v2  ;;  %v301_v3 = vld [vmem:[%s1779_s1 + $0x38] sm:$0xff]  ;;  %v300_v6 = vld [vmem:[%s1779_s1 + $0x30] sm:$0xff]  ;;  %v299_v8 = vld [vmem:[%s1779_s1 + $0x28] sm:$0xff] }
   0x4   :  { %377 = vmatpush.msra.mxu1 %v301_v3  ;;  %432 = vmatpush.msra.mxu2 %v957_v1  ;;  %v955_v9 = vld [vmem:[%s1779_s1 + $0xa0] sm:$0xff]  ;;  %v954_v12 = vld [vmem:[%s1779_s1 + $0x98] sm:$0xff]  ;;  %v953_v15 = vld [vmem:[%s1779_s1 + $0x90] sm:$0xff]  ;;  %v48_v38 = vadd.s32 120, %v1249_v37  ;;  %v47_v41 = vadd.s32 112, %v1249_v37  ;;  %v46_v44 = vadd.s32 104, %v1249_v37 }
   0x5   :  { %337 = vmatpush.msra.mxu0 %v941_v4  ;;  %v939_v10 = vld [vmem:[%s1779_s1 + $0x60] sm:$0xff]  ;;  %v938_v13 = vld [vmem:[%s1779_s1 + $0x58] sm:$0xff]  ;;  %v937_v16 = vld [vmem:[%s1779_s1 + $0x50] sm:$0xff]  ;;  %v45_v48 = vadd.s32 96, %v1249_v37  ;;  %v44_v51 = vadd.s32 88, %v1249_v37  ;;  %v43_v54 = vadd.s32 80, %v1249_v37 }
   0x6   :  { %378 = vmatpush.msra.mxu1 %v300_v6  ;;  %433 = vmatpush.msra.mxu2 %v956_v5  ;;  %v298_v11 = vld [vmem:[%s1779_s1 + $0x20] sm:$0xff]  ;;  %v297_v14 = vld [vmem:[%s1779_s1 + $0x18] sm:$0xff]  ;;  %v296_v17 = vld [vmem:[%s1779_s1 + $0x10] sm:$0xff]  ;;  %v160_v40 = vand.u32 7, %v48_v38  ;;  %v153_v43 = vand.u32 7, %v47_v41  ;;  %v146_v47 = vand.u32 7, %v46_v44 }
   0x7   :  { %338 = vmatpush.msra.mxu0 %v940_v7  ;;  %v952_v18 = vld [vmem:[%s1779_s1 + $0x88] sm:$0xff]  ;;  %v951_v21 = vld [vmem:[%s1779_s1 + $0x80] sm:$0xff]  ;;  %v292_v32 = vld [vmem:[%s1780_s0 + $0x18] sm:$0xff]  ;;  %v139_v50 = vand.u32 7, %v45_v48  ;;  %v132_v53 = vand.u32 7, %v44_v51  ;;  %v125_v56 = vand.u32 7, %v43_v54 }
   0x8   :  { %379 = vmatpush.msra.mxu1 %v299_v8  ;;  %434 = vmatpush.msra.mxu2 %v955_v9  ;;  %v936_v19 = vld [vmem:[%s1779_s1 + $0x48] sm:$0xff]  ;;  %v935_v22 = vld [vmem:[%s1779_s1 + $0x40] sm:$0xff]  ;;  %vm1256_vm1 = vcmp.eq.s32.totalorder %v160_v40, %v1252_v39  ;;  %vm1268_vm2 = vcmp.eq.s32.totalorder %v153_v43, %v1252_v39  ;;  %vm1280_vm3 = vcmp.eq.s32.totalorder %v146_v47, %v1252_v39  ;;  %v42_v57 = vadd.s32 72, %v1249_v37 }
   0x9   :  { %339 = vmatpush.msra.mxu0 %v939_v10  ;;  %v295_v20 = vld [vmem:[%s1779_s1 + $0x8] sm:$0xff]  ;;  %v294_v24 = vld [vmem:[%s1779_s1] sm:$0xff]  ;;  %963 = vmatpush.msk.msra.mxu3 %vm1256_vm1, %v1077_v45  ;;  %vm1292_vm4 = vcmp.eq.s32.totalorder %v139_v50, %v1252_v39  ;;  %vm1304_vm5 = vcmp.eq.s32.totalorder %v132_v53, %v1252_v39  ;;  %vm1316_vm6 = vcmp.eq.s32.totalorder %v125_v56, %v1252_v39  ;;  %v41_v60 = vadd.s32 64, %v1249_v37 }
   0xa   :  { %380 = vmatpush.msra.mxu1 %v298_v11  ;;  %435 = vmatpush.msra.mxu2 %v954_v12  ;;  %v398_v23 = vld [vmem:[%s1780_s0 + $0x2] sm:$0xff]  ;;  %v399_v27 = vld [vmem:[%s1780_s0 + $0xa] sm:$0xff]  ;;  %v400_v30 = vld [vmem:[%s1780_s0 + $0x1a] sm:$0xff]  ;;  %v118_v59 = vand.u32 7, %v42_v57  ;;  %v40_v63 = vadd.s32 56, %v1249_v37  ;;  %v39_v4 = vadd.s32 48, %v1249_v37 }
   0xb   :  { %340 = vmatpush.msra.mxu0 %v938_v13  ;;  %v302_v25 = vld [vmem:[%s1780_s0 + $0x1] sm:$0xff]  ;;  %v303_v28 = vld [vmem:[%s1780_s0 + $0x9] sm:$0xff]  ;;  %v304_v31 = vld [vmem:[%s1780_s0 + $0x19] sm:$0xff]  ;;  %964 = vmatpush.msk.msra.mxu3 %vm1268_vm2, %v1077_v45  ;;  %v111_v62 = vand.u32 7, %v41_v60  ;;  %v38_v7 = vadd.s32 40, %v1249_v37  ;;  %v37_v10 = vadd.s32 32, %v1249_v37 }
   0xc   :  { %381 = vmatpush.msra.mxu1 %v297_v14  ;;  %436 = vmatpush.msra.mxu2 %v953_v15  ;;  %v290_v26 = vld [vmem:[%s1780_s0] sm:$0xff]  ;;  %v291_v29 = vld [vmem:[%s1780_s0 + $0x8] sm:$0xff]  ;;  %vm1328_vm7 = vcmp.eq.s32.totalorder %v118_v59, %v1252_v39  ;;  %v104_v3 = vand.u32 7, %v40_v63  ;;  %v97_v6 = vand.u32 7, %v39_v4  ;;  %v36_v14 = vadd.s32 24, %v1249_v37 }
   0xd   :  { %341 = vmatpush.msra.mxu0 %v937_v16  ;;  %v401_v33 = vld [vmem:[%s1780_s0 + $0x22] sm:$0xff]  ;;  %965 = vmatpush.msk.msra.mxu3 %vm1280_vm3, %v1077_v45  ;;  %vm1340_vm8 = vcmp.eq.s32.totalorder %v111_v62, %v1252_v39  ;;  %v90_v9 = vand.u32 7, %v38_v7  ;;  %v83_v13 = vand.u32 7, %v37_v10  ;;  %v35_v15 = vadd.s32 16, %v1249_v37  ;;  %v1069_v36 = vld [vmem:[%s1781_s2] ss:$0 sm:$0xff] }
   0xe   :  { %382 = vmatpush.msra.mxu1 %v296_v17  ;;  %437 = vmatpush.msra.mxu2 %v952_v18  ;;  %v305_v34 = vld [vmem:[%s1780_s0 + $0x21] sm:$0xff]  ;;  %vm1352_vm9 = vcmp.eq.s32.totalorder %v104_v3, %v1252_v39  ;;  %vm1364_vm10 = vcmp.eq.s32.totalorder %v97_v6, %v1252_v39  ;;  %v34_v16 = vadd.s32 8, %v1249_v37  ;;  %v467_v46 = vld [vmem:[%s1784_s3] sm:$0x1] }
   0xf   :  { %342 = vmatpush.msra.mxu0 %v936_v19  ;;  %v293_v35 = vld [vmem:[%s1780_s0 + $0x20] sm:$0xff]  ;;  %966 = vmatpush.msk.msra.mxu3 %vm1292_vm4, %v1077_v45  ;;  %vm1376_vm11 = vcmp.eq.s32.totalorder %v90_v9, %v1252_v39  ;;  %vm1390_vm12 = vcmp.eq.s32.totalorder %v83_v13, %v1252_v39  ;;  %v1821_v19 = vmov 0 }
  0x10   :  { %383 = vmatpush.msra.mxu1 %v295_v20  ;;  %438 = vmatpush.msra.mxu2 %v951_v21  ;;  %v1822_v19 = vsel %vm1390_vm12, 4294967295, %v1821_v19  ;;  %v76_v20 = vand.u32 7, %v36_v14  ;;  %v69_v21 = vand.u32 7, %v35_v15 }
  0x11   :  { %343 = vmatpush.msra.mxu0 %v935_v22  ;;  %959 = vmatmul.msk.f32.vlgmr.msra.gmra.mxu2 %vm315_vm0, %v398_v23  ;;  %v62_v22 = vand.u32 7, %v34_v16  ;;  %v1823_v23 = vmov 0 }
  0x12   :  { %384 = vmatpush.msra.mxu1 %v294_v24  ;;  %943 = vmatmul.msk.f32.vlgmr.msra.gmra.mxu0 %vm315_vm0, %v302_v25  ;;  %vm1401_vm13 = vcmp.eq.s32.totalorder %v76_v20, %v1252_v39  ;;  %v55_v24 = vand.u32 7, %v1249_v37  ;;  %vm1410_vm14 = vcmp.eq.s32.totalorder %v69_v21, %v1252_v39  ;;  %v1825_v25 = vmov 0 }
  0x13   :  { %947 = vmatmul.msk.f32.vlgmr.msra.gmra.mxu1 %vm315_vm0, %v290_v26  ;;  %967 = vmatpush.msk.msra.mxu3 %vm1304_vm5, %v1077_v45  ;;  %v1824_v23 = vsel %vm1401_vm13, 4294967295, %v1823_v23  ;;  %v1826_v25 = vsel %vm1410_vm14, 4294967295, %v1825_v25  ;;  %vm1418_vm15 = vcmp.eq.s32.totalorder %v62_v22, %v1252_v39  ;;  %v1827_v26 = vmov 0 }
  0x14   :  { %979 = vmatpush.msk.msrb.mxu1 %vm1256_vm1, %v1077_v45  ;;  %v1828_v26 = vsel %vm1418_vm15, 4294967295, %v1827_v26 }
  0x15   :  { %968 = vmatpush.msk.msra.mxu3 %vm1316_vm6, %v1077_v45 }
  0x16   :  { %980 = vmatpush.msk.msrb.mxu1 %vm1268_vm2, %v1077_v45 }
  0x17   :  { %969 = vmatpush.msk.msra.mxu3 %vm1328_vm7, %v1077_v45 }
  0x18   :  { %981 = vmatpush.msk.msrb.mxu1 %vm1280_vm3, %v1077_v45 }
  0x19   :  { %960 = vmatmul.msk.f32.gmra.mxu2 %vm315_vm0, %v399_v27  ;;  %970 = vmatpush.msk.msra.mxu3 %vm1340_vm8, %v1077_v45 }
  0x1a   :  { %944 = vmatmul.msk.f32.gmra.mxu0 %vm315_vm0, %v303_v28  ;;  %982 = vmatpush.msk.msrb.mxu1 %vm1292_vm4, %v1077_v45 }
  0x1b   :  { %948 = vmatmul.msk.f32.gmra.mxu1 %vm315_vm0, %v291_v29  ;;  %971 = vmatpush.msk.msra.mxu3 %vm1352_vm9, %v1077_v45  ;;  %v1829_v29 = vmov 0 }
  0x1c   :  { %983 = vmatpush.msk.msrb.mxu1 %vm1304_vm5, %v1077_v45 }
  0x1d   :  { %972 = vmatpush.msk.msra.mxu3 %vm1364_vm10, %v1077_v45 }
  0x1e   :  { %984 = vmatpush.msk.msrb.mxu1 %vm1316_vm6, %v1077_v45 }
  0x1f   :  { %973 = vmatpush.msk.msra.mxu3 %vm1376_vm11, %v1077_v45 }
  0x20   :  { %985 = vmatpush.msk.msrb.mxu1 %vm1328_vm7, %v1077_v45 }
  0x21   :  { %961 = vmatmul.msk.f32.gmra.mxu2 %vm315_vm0, %v400_v30  ;;  %974 = vmatpush.msk.msra.mxu3 %vm1390_vm12, %v1077_v45 }
  0x22   :  { %945 = vmatmul.msk.f32.gmra.mxu0 %vm315_vm0, %v304_v31  ;;  %986 = vmatpush.msk.msrb.mxu1 %vm1340_vm8, %v1077_v45 }
  0x23   :  { %949 = vmatmul.msk.f32.gmra.mxu1 %vm315_vm0, %v292_v32  ;;  %975 = vmatpush.msk.msra.mxu3 %vm1401_vm13, %v1077_v45 }
  0x24   :  { %987 = vmatpush.msk.msrb.mxu1 %vm1352_vm9, %v1077_v45 }
  0x25   :  { %976 = vmatpush.msk.msra.mxu3 %vm1410_vm14, %v1077_v45 }
  0x26   :  { %988 = vmatpush.msk.msrb.mxu1 %vm1364_vm10, %v1077_v45 }
  0x27   :  { %977 = vmatpush.msk.msra.mxu3 %vm1418_vm15, %v1077_v45 }
  0x28   :  { %989 = vmatpush.msk.msrb.mxu1 %vm1376_vm11, %v1077_v45 }
  0x29   :  { %962 = vmatmul.msk.f32.gmra.mxu2 %vm315_vm0, %v401_v33 }
  0x2a   :  { %946 = vmatmul.msk.f32.gmra.mxu0 %vm315_vm0, %v305_v34  ;;  %990 = vmatpush.msk.msrb.mxu1 %vm1390_vm12, %v1077_v45 }
  0x2b   :  { %950 = vmatmul.msk.f32.gmra.mxu1 %vm315_vm0, %v293_v35  ;;  %vm1429_vm0 = vcmp.eq.s32.totalorder %v55_v24, %v1252_v39 }
  0x2c   :  { %991 = vmatpush.msk.msrb.mxu1 %vm1401_vm13, %v1077_v45  ;;  %v1830_v29 = vsel %vm1429_vm0, 4294967295, %v1829_v29  ;;  %978 = vmatpush.msk.msra.mxu3 %vm1429_vm0, %v1077_v45 }
  0x2e   :  { %992 = vmatpush.msk.msrb.mxu1 %vm1410_vm14, %v1077_v45 }
  0x30   :  { %993 = vmatpush.msk.msrb.mxu1 %vm1418_vm15, %v1077_v45  ;;  %vm546_vm15 = vcmask 64512  }
  0x32   :  { %994 = vmatpush.msk.msrb.mxu1 %vm1429_vm0, %v1077_v45 }
  0x8f   :  { %v345_v0 = vpop.f32.mrf.mxu0 }
  0x90   :  { %v386_v1 = vpop.f32.mrf.mxu1 }
  0x91   :  { %v387_v30 = vadd.f32 %v386_v1, %v345_v0 }
  0x94   :  { %v440_v11 = vpop.f32.mrf.mxu2 }
  0x95   :  { %v452_v35 = vadd.f32 %v440_v11, %v387_v30  ;;  %v631_v30 = vld [vmem:[%s1783_s5 + $0x38] sm:$0xff] }
  0x97   :  { %v348_v17 = vpop.f32.mrf.mxu0  ;;  %v459_v43 = vadd.f32 %v1069_v36, %v452_v35 }
  0x98   :  { %v389_v18 = vpop.f32.mrf.mxu1 }
  0x99   :  { %v390_v28 = vadd.f32 %v389_v18, %v348_v17  ;;  %v1450_v53 = vmax.f32 %v459_v43, 0.0 }
  0x9b   :  { %v478_v60 = vmul.f32 %v1450_v53, %v1450_v53 }
  0x9c   :  { %v443_v27 = vpop.f32.mrf.mxu2 }
  0x9d   :  { %v453_v33 = vadd.f32 %v443_v27, %v390_v28  ;;  %v279_v28 = vand.u32 7, %v1252_v39 }
  0x9f   :  { %v351_v31 = vpop.f32.mrf.mxu0  ;;  %v460_v40 = vadd.f32 %v1069_v36, %v453_v33  ;;  %vm1470_vm0 = vcmp.eq.s32.totalorder %v279_v28, %v1249_v37  ;;  %v1003_v28 = vld [vmem:[%s1783_s5 + $0xa0] sm:$0xff] }
  0xa0   :  { %v392_v32 = vpop.f32.mrf.mxu1  ;;  %995 = vmatpush.msk.msra.mxu1 %vm1470_vm0, %v1077_v45 }
  0xa1   :  { %v393_v34 = vadd.f32 %v392_v32, %v351_v31  ;;  %v1448_v50 = vmax.f32 %v460_v40, 0.0 }
  0xa3   :  { %v479_v57 = vmul.f32 %v1448_v50, %v1448_v50  ;;  %v469_v62 = vadd.f32 %v1448_v50, %v1450_v53 }
  0xa4   :  { %v446_v38 = vpop.f32.mrf.mxu2 }
  0xa5   :  { %v454_v41 = vadd.f32 %v446_v38, %v393_v34  ;;  %v482_v1 = vadd.f32 %v479_v57, %v478_v60  ;;  %v1013_v57 = vld [vmem:[%s1783_s5 + $0xf0] sm:$0xff] }
  0xa6   :  { %v1029_v60 = vld [vmem:[%s1783_s5 + $0x170] sm:$0xff] }
  0xa7   :  { %v461_v44 = vadd.f32 %v1069_v36, %v454_v41  ;;  %v354_v47 = vpop.f32.mrf.mxu0 }
  0xa8   :  { %v395_v48 = vpop.f32.mrf.mxu1 }
  0xa9   :  { %v396_v51 = vadd.f32 %v395_v48, %v354_v47  ;;  %v1452_v54 = vmax.f32 %v461_v44, 0.0  ;;  %v1014_v48 = vld [vmem:[%s1783_s5 + $0xf8] sm:$0xff] }
  0xaa   :  { %661 = vmatpush.msrb.mxu2 %v1014_v48  ;;  %v1017_v48 = vld [vmem:[%s1783_s5 + $0x110] sm:$0xff] }
  0xab   :  { %v480_v63 = vmul.f32 %v1452_v54, %v1452_v54  ;;  %v470_v3 = vadd.f32 %v469_v62, %v1452_v54  ;;  %v1012_v62 = vld [vmem:[%s1783_s5 + $0xe8] sm:$0xff] }
  0xac   :  { %v449_v56 = vpop.f32.mrf.mxu2  ;;  %662 = vmatpush.msrb.mxu2 %v1013_v57  ;;  %v1016_v57 = vld [vmem:[%s1783_s5 + $0x108] sm:$0xff] }
  0xad   :  { %v455_v59 = vadd.f32 %v449_v56, %v396_v51  ;;  %v483_v6 = vadd.f32 %v482_v1, %v480_v63  ;;  %v639_v51 = vld [vmem:[%s1783_s5 + $0x78] sm:$0xff]  ;;  %v637_v63 = vld [vmem:[%s1783_s5 + $0x68] sm:$0xff]  ;;  %v1011_v1 = vld [vmem:[%s1783_s5 + $0xe0] sm:$0xff] }
  0xae   :  { %v1030_v56 = vld [vmem:[%s1783_s5 + $0x178] sm:$0xff]  ;;  %690 = vmatpush.msrb.mxu3 %v639_v51  ;;  %663 = vmatpush.msrb.mxu2 %v1012_v62  ;;  %v1078_v51 = vmov 0.0  }
  0xaf   :  { %v462_v0 = vadd.f32 %v1069_v36, %v455_v59  ;;  %740 = vmatpush.msrb.mxu0 %v1030_v56  ;;  %v638_v59 = vld [vmem:[%s1783_s5 + $0x70] sm:$0xff]  ;;  %611 = vst [vmem:[#allocation2] sm:$0x1] %v1078_v51  ;;  %v625_v56 = vld [vmem:[%s1783_s5 + $0x8] sm:$0xff] }
  0xb0   :  { %691 = vmatpush.msrb.mxu3 %v638_v59  ;;  %664 = vmatpush.msrb.mxu2 %v1011_v1  ;;  %612 = vst [vmem:[#allocation2 + $0x18] sm:$0x1] %v1078_v51  ;;  %v624_v59 = vld [vmem:[%s1783_s5] sm:$0xff] }
  0xb1   :  { %v1463_v4 = vmax.f32 %v462_v0, 0.0  ;;  %v1028_v0 = vld [vmem:[%s1783_s5 + $0x168] sm:$0xff]  ;;  %741 = vmatpush.msrb.mxu0 %v1029_v60  ;;  %613 = vst [vmem:[#allocation2 + $0x11] sm:$0x1] %v1078_v51  ;;  %v1015_v60 = vld [vmem:[%s1783_s5 + $0x100] sm:$0xff] }
  0xb2   :  { %692 = vmatpush.msrb.mxu3 %v637_v63  ;;  %614 = vst [vmem:[#allocation2 + $0x29] sm:$0x1] %v1078_v51 }
  0xb3   :  { %v481_v7 = vmul.f32 %v1463_v4, %v1463_v4  ;;  %v471_v9 = vadd.f32 %v470_v3, %v1463_v4  ;;  %v636_v3 = vld [vmem:[%s1783_s5 + $0x60] sm:$0xff]  ;;  %742 = vmatpush.msrb.mxu0 %v1028_v0 }
  0xb4   :  { %693 = vmatpush.msrb.mxu3 %v636_v3  ;;  %v1070_v3 = vld [vmem:[%s1782_s4] ss:$0 sm:$0xff] }
  0xb5   :  { %v484_v10 = vadd.f32 %v483_v6, %v481_v7  ;;  %v472_v11 = vrot.slane %v471_v9, 4  ;;  %v1027_v6 = vld [vmem:[%s1783_s5 + $0x160] sm:$0xff]  ;;  %v1010_v7 = vld [vmem:[%s1783_s5 + $0xd8] sm:$0xff] }
  0xb6   :  { %743 = vmatpush.msrb.mxu0 %v1027_v6  ;;  %665 = vmatpush.msrb.mxu2 %v1010_v7 }
  0xb7   :  { %v473_v13 = vadd.f32 %v472_v11, %v471_v9  ;;  %v485_v14 = vrot.slane %v484_v10, 4  ;;  %v635_v9 = vld [vmem:[%s1783_s5 + $0x58] sm:$0xff]  ;;  %v1009_v11 = vld [vmem:[%s1783_s5 + $0xd0] sm:$0xff] }
  0xb8   :  { %694 = vmatpush.msrb.mxu3 %v635_v9  ;;  %666 = vmatpush.msrb.mxu2 %v1009_v11 }
  0xb9   :  { %v474_v15 = vrot.slane %v473_v13, 2  ;;  %v486_v16 = vadd.f32 %v485_v14, %v484_v10  ;;  %v1026_v10 = vld [vmem:[%s1783_s5 + $0x158] sm:$0xff]  ;;  %v1025_v14 = vld [vmem:[%s1783_s5 + $0x150] sm:$0xff] }
  0xba   :  { %744 = vmatpush.msrb.mxu0 %v1026_v10 }
  0xbb   :  { %v475_v17 = vadd.f32 %v474_v15, %v473_v13  ;;  %v487_v18 = vrot.slane %v486_v16, 2  ;;  %v634_v13 = vld [vmem:[%s1783_s5 + $0x50] sm:$0xff]  ;;  %v1008_v15 = vld [vmem:[%s1783_s5 + $0xc8] sm:$0xff] }
  0xbc   :  { %695 = vmatpush.msrb.mxu3 %v634_v13  ;;  %745 = vmatpush.msrb.mxu0 %v1025_v14 }
  0xbd   :  { %v476_v20 = vrot.slane %v475_v17, 1  ;;  %v488_v21 = vadd.f32 %v487_v18, %v486_v16  ;;  %v633_v16 = vld [vmem:[%s1783_s5 + $0x48] sm:$0xff]  ;;  %v1007_v18 = vld [vmem:[%s1783_s5 + $0xc0] sm:$0xff]  ;;  %667 = vmatpush.msrb.mxu2 %v1008_v15 }
  0xbe   :  { %696 = vmatpush.msrb.mxu3 %v633_v16 }
  0xbf   :  { %v477_v22 = vadd.f32 %v476_v20, %v475_v17  ;;  %v489_v24 = vrot.slane %v488_v21, 1  ;;  %v1024_v17 = vld [vmem:[%s1783_s5 + $0x148] sm:$0xff]  ;;  %668 = vmatpush.msrb.mxu2 %v1007_v18  ;;  %v1006_v20 = vld [vmem:[%s1783_s5 + $0xb8] sm:$0xff] }
  0xc0   :  { %746 = vmatpush.msrb.mxu0 %v1024_v17 }
  0xc1   :  { %507 = vmatmul.f32.vlgmr.msra.gmra.mxu3 %v477_v22  ;;  %v490_v27 = vadd.f32 %v489_v24, %v488_v21  ;;  %669 = vmatpush.msrb.mxu2 %v1006_v20  ;;  %v1005_v21 = vld [vmem:[%s1783_s5 + $0xb0] sm:$0xff]  ;;  %v1004_v22 = vld [vmem:[%s1783_s5 + $0xa8] sm:$0xff]  ;;  %v632_v24 = vld [vmem:[%s1783_s5 + $0x40] sm:$0xff] }
  0xc2   :  { %697 = vmatpush.msrb.mxu3 %v632_v24  ;;  %v1071_v24 = vld [vmem:[%s1785_s6] ss:$0 sm:$0xff] }
  0xc3   :  { %528 = vmatmul.f32.vlgmr.msrb.gmra.mxu1 %v490_v27  ;;  %670 = vmatpush.msrb.mxu2 %v1005_v21  ;;  %v1023_v27 = vld [vmem:[%s1783_s5 + $0x140] sm:$0xff] }
  0xc4   :  { %997 = vmatpush.msk.msrb.mxu1 %vm1470_vm0, %v1077_v45  ;;  %747 = vmatpush.msrb.mxu0 %v1023_v27 }
  0xc5   :  { %671 = vmatpush.msrb.mxu2 %v1004_v22  ;;  %698 = vmatpush.msrb.mxu3 %v631_v30 }
  0xc7   :  { %672 = vmatpush.msrb.mxu2 %v1003_v28 }
 0x140   :  { %v529_v31 = vpop.f32.mrf.mxu1 }
 0x141   :  { %v532_v34 = vmul.f32 0.001953125, %v529_v31  ;;  %v1022_v31 = vld [vmem:[%s1783_s5 + $0x138] sm:$0xff] }
 0x142   :  { %748 = vmatpush.msrb.mxu0 %v1022_v31 }
 0x144   :  { %v508_v32 = vpop.f32.mrf.mxu3 }
 0x145   :  { %v511_v33 = vmul.f32 0.001953125, %v508_v32  ;;  %v1002_v32 = vld [vmem:[%s1783_s5 + $0x98] sm:$0xff] }
 0x146   :  { %673 = vmatpush.msrb.mxu2 %v1002_v32 }
 0x147   :  { %v533_v35 = vmul.f32 %v511_v33, %v511_v33  ;;  %996 = vmatmul.msk.f32.vlgmr.msra.gmra.mxu1 %vm546_vm15, %v511_v33  ;;  %v630_v33 = vld [vmem:[%s1783_s5 + $0x30] sm:$0xff] }
 0x148   :  { %1063 = vmatpush.msk.msra.mxu1 %vm1470_vm0, %v1077_v45  ;;  %699 = vmatpush.msrb.mxu3 %v630_v33 }
 0x149   :  { %v534_v37 = vsub.f32 %v532_v34, %v533_v35  ;;  %v1021_v34 = vld [vmem:[%s1783_s5 + $0x130] sm:$0xff] }
 0x14a   :  { %v1001_v35 = vld [vmem:[%s1783_s5 + $0x90] sm:$0xff]  ;;  %749 = vmatpush.msrb.mxu0 %v1021_v34 }
 0x14b   :  { %v535_v39 = vadd.f32 1e-05, %v534_v37  ;;  %v629_v37 = vld [vmem:[%s1783_s5 + $0x28] sm:$0xff]  ;;  %674 = vmatpush.msrb.mxu2 %v1001_v35 }
 0x14c   :  { %700 = vmatpush.msrb.mxu3 %v629_v37 }
 0x14d   :  { %1073 = vrsqrt.f32 %v535_v39  ;;  %vm542_vm13 = vweird.f32 %v535_v39 }
 0x153   :  { %v1074_v36 = vpop.eup %1073 }
 0x154   :  { %v537_v38 = vmul.f32 %v1074_v36, %v535_v39  ;;  %vm543_vm14 = vweird.f32 %v1074_v36  ;;  %v1020_v39 = vld [vmem:[%s1783_s5 + $0x128] sm:$0xff] }
 0x155   :  { %vm544_vm12 = vmor %vm542_vm13, %vm543_vm14  ;;  %750 = vmatpush.msrb.mxu0 %v1020_v39 }
 0x156   :  { %v538_v40 = vmul.f32 %v1074_v36, %v537_v38  ;;  %v628_v38 = vld [vmem:[%s1783_s5 + $0x20] sm:$0xff] }
 0x157   :  { %701 = vmatpush.msrb.mxu3 %v628_v38 }
 0x158   :  { %v539_v41 = vmul.f32 0.5, %v538_v40  ;;  %v1019_v40 = vld [vmem:[%s1783_s5 + $0x120] sm:$0xff] }
 0x159   :  { %751 = vmatpush.msrb.mxu0 %v1019_v40 }
 0x15a   :  { %v540_v43 = vsub.f32 1.5, %v539_v41  ;;  %v999_v41 = vld [vmem:[%s1783_s5 + $0x80] sm:$0xff] }
 0x15c   :  { %v541_v44 = vmul.f32 %v1074_v36, %v540_v43  ;;  %v627_v43 = vld [vmem:[%s1783_s5 + $0x18] sm:$0xff] }
 0x15d   :  { %702 = vmatpush.msrb.mxu3 %v627_v43 }
 0x15e   :  { %v545_v47 = vsel %vm544_vm12, %v1074_v36, %v541_v44  ;;  %v1000_v36 = vld [vmem:[%s1783_s5 + $0x88] sm:$0xff]  ;;  %v1018_v44 = vld [vmem:[%s1783_s5 + $0x118] sm:$0xff] }
 0x15f   :  { %998 = vmatmul.msk.f32.vlgmr.msrb.gmra.mxu1 %vm546_vm15, %v545_v47  ;;  %675 = vmatpush.msrb.mxu2 %v1000_v36  ;;  %v626_v47 = vld [vmem:[%s1783_s5 + $0x10] sm:$0xff] }
 0x160   :  { %1065 = vmatpush.msk.msrb.mxu1 %vm1470_vm0, %v1077_v45  ;;  %752 = vmatpush.msrb.mxu0 %v1018_v44 }
 0x161   :  { %676 = vmatpush.msrb.mxu2 %v999_v41  ;;  %703 = vmatpush.msrb.mxu3 %v626_v47 }
 0x162   :  { %753 = vmatpush.msrb.mxu0 %v1017_v48 }
 0x163   :  { %1047 = vmatpush.msk.msra.mxu2 %vm1256_vm1, %v1077_v45  ;;  %704 = vmatpush.msrb.mxu3 %v625_v56 }
 0x164   :  { %754 = vmatpush.msrb.mxu0 %v1016_v57 }
 0x165   :  { %1048 = vmatpush.msk.msra.mxu2 %vm1268_vm2, %v1077_v45  ;;  %705 = vmatpush.msrb.mxu3 %v624_v59 }
 0x166   :  { %755 = vmatpush.msrb.mxu0 %v1015_v60 }
 0x167   :  { %1049 = vmatpush.msk.msra.mxu2 %vm1280_vm3, %v1077_v45 }
 0x168   :  { %1031 = vmatpush.msk.msra.mxu0 %vm1256_vm1, %v1077_v45  ;;  %vm1833_vm1 = vnez %v1822_v19 }
 0x169   :  { %1050 = vmatpush.msk.msra.mxu2 %vm1292_vm4, %v1077_v45 }
 0x16a   :  { %1032 = vmatpush.msk.msra.mxu0 %vm1268_vm2, %v1077_v45  ;;  %vm1834_vm2 = vnez %v1824_v23 }
 0x16b   :  { %1051 = vmatpush.msk.msra.mxu2 %vm1304_vm5, %v1077_v45 }
 0x16c   :  { %1033 = vmatpush.msk.msra.mxu0 %vm1280_vm3, %v1077_v45  ;;  %vm1835_vm3 = vnez %v1826_v25 }
 0x16d   :  { %1052 = vmatpush.msk.msra.mxu2 %vm1316_vm6, %v1077_v45 }
 0x16e   :  { %1034 = vmatpush.msk.msra.mxu0 %vm1292_vm4, %v1077_v45  ;;  %vm1836_vm4 = vnez %v1828_v26 }
 0x16f   :  { %1053 = vmatpush.msk.msra.mxu2 %vm1328_vm7, %v1077_v45 }
 0x170   :  { %1035 = vmatpush.msk.msra.mxu0 %vm1304_vm5, %v1077_v45  ;;  %vm1837_vm5 = vnez %v1830_v29 }
 0x171   :  { %1054 = vmatpush.msk.msra.mxu2 %vm1340_vm8, %v1077_v45 }
 0x172   :  { %1036 = vmatpush.msk.msra.mxu0 %vm1316_vm6, %v1077_v45 }
 0x173   :  { %1055 = vmatpush.msk.msra.mxu2 %vm1352_vm9, %v1077_v45 }
 0x174   :  { %1037 = vmatpush.msk.msra.mxu0 %vm1328_vm7, %v1077_v45 }
 0x175   :  { %1056 = vmatpush.msk.msra.mxu2 %vm1364_vm10, %v1077_v45 }
 0x176   :  { %1038 = vmatpush.msk.msra.mxu0 %vm1340_vm8, %v1077_v45 }
 0x177   :  { %1057 = vmatpush.msk.msra.mxu2 %vm1376_vm11, %v1077_v45 }
 0x178   :  { %1039 = vmatpush.msk.msra.mxu0 %vm1352_vm9, %v1077_v45 }
 0x179   :  { %1058 = vmatpush.msk.msra.mxu2 %vm1833_vm1, %v1077_v45 }
 0x17a   :  { %1040 = vmatpush.msk.msra.mxu0 %vm1364_vm10, %v1077_v45 }
 0x17b   :  { %1059 = vmatpush.msk.msra.mxu2 %vm1834_vm2, %v1077_v45 }
 0x17c   :  { %1041 = vmatpush.msk.msra.mxu0 %vm1376_vm11, %v1077_v45 }
 0x17d   :  { %1060 = vmatpush.msk.msra.mxu2 %vm1835_vm3, %v1077_v45 }
 0x17e   :  { %1042 = vmatpush.msk.msra.mxu0 %vm1833_vm1, %v1077_v45 }
 0x17f   :  { %1061 = vmatpush.msk.msra.mxu2 %vm1836_vm4, %v1077_v45 }
 0x180   :  { %1043 = vmatpush.msk.msra.mxu0 %vm1834_vm2, %v1077_v45 }
 0x181   :  { %1062 = vmatpush.msk.msra.mxu2 %vm1837_vm5, %v1077_v45 }
 0x182   :  { %1044 = vmatpush.msk.msra.mxu0 %vm1835_vm3, %v1077_v45 }
 0x184   :  { %1045 = vmatpush.msk.msra.mxu0 %vm1836_vm4, %v1077_v45 }
 0x186   :  { %1046 = vmatpush.msk.msra.mxu0 %vm1837_vm5, %v1077_v45 }
 0x1c4   :  { %v567_v62 = vpop.f32.mrf.mxu1 }
 0x1c5   :  { %v593_v42 = vperm.slane %v567_v62, 0 }
 0x1c7   :  { %v594_v55 = vsub.f32 %v1450_v53, %v593_v42  ;;  %v595_v63 = vsub.f32 %v1448_v50, %v593_v42  ;;  %v596_v58 = vsub.f32 %v1452_v54, %v593_v42  ;;  %v597_v0 = vsub.f32 %v1463_v4, %v593_v42 }
 0x1dc   :  { %v590_v49 = vpop.f32.mrf.mxu1 }
 0x1dd   :  { %v598_v52 = vmul.f32 %v590_v49, %v467_v46 }
 0x1df   :  { %v599_v1 = vperm.slane %v598_v52, 0 }
 0x1e1   :  { %v600_v61 = vmul.f32 %v599_v1, %v594_v55  ;;  %v601_v53 = vmul.f32 %v599_v1, %v595_v63  ;;  %v602_v50 = vmul.f32 %v599_v1, %v596_v58  ;;  %v603_v6 = vmul.f32 %v599_v1, %v597_v0 }
 0x1e3   :  { %v607_v54 = vadd.f32 %v1070_v3, %v600_v61  ;;  %v608_v4 = vadd.f32 %v1070_v3, %v601_v53  ;;  %v609_v2 = vadd.f32 %v1070_v3, %v602_v50  ;;  %v610_v7 = vadd.f32 %v1070_v3, %v603_v6 }
 0x1e5   :  { %615 = vst [vmem:[#allocation2 + $0x1] sm:$0xff] %v607_v54  ;;  %677 = vmatmul.f32.vlgmr.msrb.gmra.mxu2 %v607_v54 }
 0x1e6   :  { %616 = vst [vmem:[#allocation2 + $0x9] sm:$0xff] %v608_v4 }
 0x1e7   :  { %617 = vst [vmem:[#allocation2 + $0x19] sm:$0xff] %v609_v2 }
 0x1e8   :  { %618 = vst [vmem:[#allocation2 + $0x21] sm:$0xff] %v610_v7 }
 0x1ec   :  { %v620_v5 = vld [vmem:[#allocation2] sm:$0xff] }
 0x1ed   :  { %706 = vmatmul.f32.vlgmr.msrb.gmra.mxu3 %v620_v5  ;;  %v719_v8 = vld [vmem:[#allocation2 + $0x2] sm:$0xff]  ;;  %680 = vmatmul.f32.gmra.mxu2 %v608_v4  ;;  %v720_v19 = vld [vmem:[#allocation2 + $0xa] sm:$0xff] }
 0x1ee   :  { %756 = vmatmul.f32.vlgmr.msrb.gmra.mxu0 %v719_v8  ;;  %v621_v12 = vld [vmem:[#allocation2 + $0x8] sm:$0xff]  ;;  %v622_v23 = vld [vmem:[#allocation2 + $0x18] sm:$0xff] }
 0x1ef   :  { %v721_v25 = vld [vmem:[#allocation2 + $0x1a] sm:$0xff]  ;;  %v722_v10 = vld [vmem:[#allocation2 + $0x22] sm:$0xff] }
 0x1f0   :  { %v623_v9 = vld [vmem:[#allocation2 + $0x20] sm:$0xff] }
 0x1f5   :  { %709 = vmatmul.f32.gmra.mxu3 %v621_v12  ;;  %683 = vmatmul.f32.gmra.mxu2 %v609_v2 }
 0x1f6   :  { %759 = vmatmul.f32.gmra.mxu0 %v720_v19 }
 0x1fd   :  { %712 = vmatmul.f32.gmra.mxu3 %v622_v23  ;;  %686 = vmatmul.f32.gmra.mxu2 %v610_v7 }
 0x1fe   :  { %762 = vmatmul.f32.gmra.mxu0 %v721_v25 }
 0x205   :  { %715 = vmatmul.f32.gmra.mxu3 %v623_v9 }
 0x206   :  { %765 = vmatmul.f32.gmra.mxu0 %v722_v10 }
 0x268   :  { %v678_v26 = vpop.f32.mrf.mxu2 }
 0x26b   :  { %v757_v11 = vpop.f32.mrf.mxu0 }
 0x270   :  { %v707_v13 = vpop.f32.mrf.mxu3  ;;  %v681_v14 = vpop.f32.mrf.mxu2 }
 0x271   :  { %v708_v16 = vadd.f32 %v707_v13, %v678_v26 }
 0x273   :  { %v760_v29 = vpop.f32.mrf.mxu0  ;;  %v769_v22 = vadd.f32 %v757_v11, %v708_v16 }
 0x275   :  { %v776_v31 = vadd.f32 %v1071_v24, %v769_v22 }
 0x277   :  { %v1743_v37 = vmax.f32 %v776_v31, 0.0 }
 0x278   :  { %v710_v45 = vpop.f32.mrf.mxu3  ;;  %v684_v17 = vpop.f32.mrf.mxu2 }
 0x279   :  { %v711_v15 = vadd.f32 %v710_v45, %v681_v14  ;;  %v795_v43 = vmul.f32 %v1743_v37, %v1743_v37  ;;  %v784_v14 = vld [vmem:[%s1787_s7] sm:$0x1] }
 0x27b   :  { %v770_v18 = vadd.f32 %v760_v29, %v711_v15  ;;  %v763_v20 = vpop.f32.mrf.mxu0 }
 0x27d   :  { %v777_v28 = vadd.f32 %v1071_v24, %v770_v18 }
 0x27f   :  { %v1741_v33 = vmax.f32 %v777_v28, 0.0 }
 0x280   :  { %v713_v21 = vpop.f32.mrf.mxu3  ;;  %v687_v34 = vpop.f32.mrf.mxu2 }
 0x281   :  { %v714_v27 = vadd.f32 %v713_v21, %v684_v17  ;;  %v796_v40 = vmul.f32 %v1741_v33, %v1741_v33  ;;  %v786_v44 = vadd.f32 %v1741_v33, %v1743_v37  ;;  %v1072_v21 = vld [vmem:[%s1786_s8] ss:$0 sm:$0xff] }
 0x283   :  { %v771_v30 = vadd.f32 %v763_v20, %v714_v27  ;;  %v766_v38 = vpop.f32.mrf.mxu0  ;;  %v799_v51 = vadd.f32 %v796_v40, %v795_v43 }
 0x285   :  { %v778_v32 = vadd.f32 %v1071_v24, %v771_v30 }
 0x287   :  { %v1745_v39 = vmax.f32 %v778_v32, 0.0 }
 0x288   :  { %v716_v35 = vpop.f32.mrf.mxu3 }
 0x289   :  { %v717_v36 = vadd.f32 %v716_v35, %v687_v34  ;;  %v797_v47 = vmul.f32 %v1745_v39, %v1745_v39  ;;  %v787_v56 = vadd.f32 %v786_v44, %v1745_v39 }
 0x28b   :  { %v772_v41 = vadd.f32 %v766_v38, %v717_v36  ;;  %v800_v59 = vadd.f32 %v799_v51, %v797_v47 }
 0x28d   :  { %v779_v48 = vadd.f32 %v1071_v24, %v772_v41 }
 0x28f   :  { %v783_v57 = vmax.f32 %v779_v48, 0.0 }
 0x291   :  { %v788_v60 = vadd.f32 %v787_v56, %v783_v57  ;;  %v798_v62 = vmul.f32 %v783_v57, %v783_v57 }
 0x293   :  { %v789_v42 = vrot.slane %v788_v60, 4  ;;  %v801_v46 = vadd.f32 %v800_v59, %v798_v62 }
 0x295   :  { %v790_v49 = vadd.f32 %v789_v42, %v788_v60  ;;  %v802_v52 = vrot.slane %v801_v46, 4 }
 0x297   :  { %v791_v55 = vrot.slane %v790_v49, 2  ;;  %v803_v63 = vadd.f32 %v802_v52, %v801_v46 }
 0x299   :  { %v792_v58 = vadd.f32 %v791_v55, %v790_v49  ;;  %v804_v0 = vrot.slane %v803_v63, 2 }
 0x29b   :  { %v793_v1 = vrot.slane %v792_v58, 1  ;;  %v805_v3 = vadd.f32 %v804_v0, %v803_v63 }
 0x29d   :  { %v794_v61 = vadd.f32 %v793_v1, %v792_v58  ;;  %v806_v53 = vrot.slane %v805_v3, 1 }
 0x29f   :  { %824 = vmatmul.f32.vlgmr.msra.gmra.mxu0 %v794_v61  ;;  %v807_v50 = vadd.f32 %v806_v53, %v805_v3 }
 0x2a1   :  { %845 = vmatmul.f32.vlgmr.msra.gmra.mxu2 %v807_v50 }
 0x31c   :  { %v825_v6 = vpop.f32.mrf.mxu0 }
 0x31d   :  { %v828_v54 = vmul.f32 0.001953125, %v825_v6 }
 0x31f   :  { %1064 = vmatmul.msk.f32.vlgmr.msra.gmra.mxu1 %vm546_vm15, %v828_v54  ;;  %v850_v2 = vmul.f32 %v828_v54, %v828_v54 }
 0x324   :  { %v846_v4 = vpop.f32.mrf.mxu2 }
 0x325   :  { %v849_v7 = vmul.f32 0.001953125, %v846_v4 }
 0x327   :  { %v851_v5 = vsub.f32 %v849_v7, %v850_v2 }
 0x329   :  { %v852_v8 = vadd.f32 1e-05, %v851_v5 }
 0x32b   :  { %1075 = vrsqrt.f32 %v852_v8  ;;  %vm859_vm7 = vweird.f32 %v852_v8 }
 0x331   :  { %v1076_v12 = vpop.eup %1075 }
 0x332   :  { %v854_v19 = vmul.f32 %v1076_v12, %v852_v8  ;;  %vm860_vm6 = vweird.f32 %v1076_v12 }
 0x333   :  { %vm861_vm8 = vmor %vm859_vm7, %vm860_vm6 }
 0x334   :  { %v855_v23 = vmul.f32 %v1076_v12, %v854_v19 }
 0x336   :  { %v856_v25 = vmul.f32 0.5, %v855_v23 }
 0x338   :  { %v857_v9 = vsub.f32 1.5, %v856_v25 }
 0x33a   :  { %v858_v10 = vmul.f32 %v1076_v12, %v857_v9 }
 0x33c   :  { %v862_v26 = vsel %vm861_vm8, %v1076_v12, %v858_v10 }
 0x33d   :  { %1066 = vmatmul.msk.f32.vlgmr.msrb.gmra.mxu1 %vm546_vm15, %v862_v26 }
 0x39c   :  { %v883_v11 = vpop.f32.mrf.mxu1 }
 0x39d   :  { %v909_v13 = vperm.slane %v883_v11, 0 }
 0x39f   :  { %v910_v15 = vsub.f32 %v1743_v37, %v909_v13  ;;  %v911_v16 = vsub.f32 %v1741_v33, %v909_v13  ;;  %v912_v17 = vsub.f32 %v1745_v39, %v909_v13  ;;  %v913_v18 = vsub.f32 %v783_v57, %v909_v13 }
 0x3ba   :  { %v906_v29 = vpop.f32.mrf.mxu1 }
 0x3bb   :  { %v914_v45 = vmul.f32 %v906_v29, %v784_v14 }
 0x3bd   :  { %v915_v20 = vperm.slane %v914_v45, 0 }
 0x3bf   :  { %v916_v22 = vmul.f32 %v915_v20, %v910_v15  ;;  %v917_v24 = vmul.f32 %v915_v20, %v911_v16  ;;  %v918_v27 = vmul.f32 %v915_v20, %v912_v17  ;;  %v919_v28 = vmul.f32 %v915_v20, %v913_v18 }
 0x3c1   :  { %v923_v30 = vadd.f32 %v1072_v21, %v916_v22  ;;  %v924_v31 = vadd.f32 %v1072_v21, %v917_v24  ;;  %v925_v32 = vadd.f32 %v1072_v21, %v918_v27  ;;  %v926_v34 = vadd.f32 %v1072_v21, %v919_v28 }
 0x3c3   :  { %927 = vst [vmem:[%s1788_s9] sm:$0xff] %v923_v30 }
 0x3c4   :  { %928 = vst [vmem:[%s1788_s9 + $0x8] sm:$0xff] %v924_v31 }
 0x3c5   :  { %929 = vst [vmem:[%s1788_s9 + $0x10] sm:$0xff] %v925_v32 }
 0x3c6   :  { %930 = vst [vmem:[%s1788_s9 + $0x18] sm:$0xff] %v926_v34 }

</bundles_post_ra>
